<compile_context>
chip_gen: v7x
topology: tpu7x:2x2x1
jax: 0.10.0
libtpu: 0.0.40
codegen_flags: <defaults>
</compile_context>

<pallas_src>
import jax
import jax.numpy as jnp
from jax.experimental import pallas as pl
from jax.experimental.pallas import tpu as pltpu


def _round_up(x, m):
    return (x + m - 1) // m * m


def _vmem_cap_bytes():
    try:
        return int(pltpu.get_tpu_info().vmem_capacity_bytes)
    except Exception:
        return 64 * 1024 * 1024  # conservative (v7x per-TC)


def _pick_tb(B, H, vec_itemsize, block_b):
    b8 = _round_up(B, 8)
    if block_b is not None:
        return max(8, min(_round_up(block_b, 8), b8))
    # Per-row working set ~ vec tile + out1 tile + f32 VPU temps.
    row_bytes = 3 * H * max(vec_itemsize, 4) * 3
    tb = max(8, min(512, ((2 * 1024 * 1024) // max(row_bytes, 1)) // 8 * 8))
    tb = min(tb, b8)
    # v7x has 2 TensorCores: keep the (parallel) batch grid splittable.
    if b8 >= 16:
        tb = min(tb, _round_up(-(-B // 2), 8))
    return max(tb, 8)


def _vmem_limit_bytes(TB, H, vec_bytes, out_bytes, param_bytes):
    tiles = 2 * (TB * 3 * H * vec_bytes + TB * 3 * H * out_bytes + TB * H * out_bytes)
    resident = 2 * (3 * H + H * H + 4 * H) * param_bytes   # default double-buffered
    scratch = 4 * TB * H * param_bytes
    temps = 12 * TB * H * 4                                # f32 VPU temps + matmul result
    need = tiles + resident + scratch + temps + (2 << 20)
    cap = _vmem_cap_bytes()
    return int(min(max(2 * need, 32 << 20), int(0.8 * cap)))


def _woperator_kernel(vec_ref, wc_ref, wt_ref, bias4_ref, out1_ref, out2_ref, lhs_ref):
    # vec_ref   : (TB, 3H)   batch tile, components as three H-wide lane slabs
    # wc_ref    : (3, H)     WOperator.weight (cross weight), resident
    # wt_ref    : (H, H)     LinearBiasSmall.weight transposed -> (in, out), resident
    # bias4_ref : (4, H)     rows 0..2 = bias_adj per component, row 3 = its sum
    # out1_ref  : (TB, 3H)
    # out2_ref  : (TB, H)
    # lhs_ref   : (4*TB, H)  VMEM scratch in the matmul (weight) dtype
    f32 = jnp.float32
    tb = vec_ref.shape[0]
    h = wt_ref.shape[0]
    mm_dtype = wt_ref.dtype

    # Per-component loads (no whole-tile f32 temp).
    a0 = vec_ref[:, 0 * h:1 * h].astype(f32)
    a1 = vec_ref[:, 1 * h:2 * h].astype(f32)
    a2 = vec_ref[:, 2 * h:3 * h].astype(f32)

    wc = wc_ref[...].astype(f32)          # (3, h)
    b0 = wc[0:1, :]
    b1 = wc[1:2, :]
    b2 = wc[2:3, :]

    # cross(vec, Wp, dim=1) on the VPU; pre-sum over the 3-axis for out2
    # (matmul is linear -> identical result, 3x fewer MXU FLOPs for out2).
    # Cast-on-store into the matmul-dtype scratch (no f32 concat temp).
    lhs_ref[0 * tb:1 * tb, :] = (a1 * b2 - a2 * b1).astype(mm_dtype)
    lhs_ref[1 * tb:2 * tb, :] = (a2 * b0 - a0 * b2).astype(mm_dtype)
    lhs_ref[2 * tb:3 * tb, :] = (a0 * b1 - a1 * b0).astype(mm_dtype)
    lhs_ref[3 * tb:4 * tb, :] = (a0 + a1 + a2).astype(mm_dtype)

    # Single fused MXU matmul: one weight push, 4*TB dense rows, f32 accumulate.
    y = jnp.dot(lhs_ref[...], wt_ref[...], preferred_element_type=jnp.float32)

    bias = bias4_ref[...].astype(f32)     # (4, h)
    odt1 = out1_ref.dtype
    out1_ref[:, 0 * h:1 * h] = (y[0 * tb:1 * tb, :] + bias[0:1, :]).astype(odt1)
    out1_ref[:, 1 * h:2 * h] = (y[1 * tb:2 * tb, :] + bias[1:2, :]).astype(odt1)
    out1_ref[:, 2 * h:3 * h] = (y[2 * tb:3 * tb, :] + bias[2:3, :]).astype(odt1)
    out2_ref[...] = (y[3 * tb:4 * tb, :] + bias[3:4, :]).astype(out2_ref.dtype)


def woperator_forward(vec, w_cross, lin_weight, lin_bias, *, block_b=None):
    """vec: (B,3,H); w_cross: (1,3,H); lin_weight: (H,H) (out,in); lin_bias: (H,3)."""
    B, T, H = vec.shape
    assert T == 3
    dtype = vec.dtype
    param_dtype = lin_weight.dtype

    TB = _pick_tb(B, H, jnp.dtype(dtype).itemsize, block_b)
    Bp = _round_up(B, TB)
    grid_b = Bp // TB

    # ---- layout plumbing (all free or tiny) --------------------------------
    vec2d = vec.reshape(B, 3 * H)                 # free: merges contiguous dims
    if Bp != B:                                   # only for ragged / tiny batches
        vec2d = jnp.pad(vec2d, ((0, Bp - B), (0, 0)))

    wc = jnp.squeeze(w_cross, axis=0)             # (3, H)
    wt = lin_weight.T                             # (H, H) = (in, out); one-time H^2

    # Bias normalisation hoisted out of the kernel (tiny 3xH computation).
    bias_f32 = lin_bias.astype(jnp.float32)       # (H, 3)
    norm = jnp.maximum(jnp.sqrt(jnp.sum(bias_f32 ** 2, axis=1) + 1e-8), 1e-6)
    bias_adj = (bias_f32 / norm[:, None]).T       # (3, H)
    bias4 = jnp.concatenate(
        [bias_adj, jnp.sum(bias_adj, axis=0, keepdims=True)], axis=0)  # (4, H)

    out_shape = (
        jax.ShapeDtypeStruct((Bp, 3 * H), dtype),
        jax.ShapeDtypeStruct((Bp, H), dtype),
    )
    vmem_limit = _vmem_limit_bytes(
        TB, H, jnp.dtype(dtype).itemsize, jnp.dtype(dtype).itemsize,
        jnp.dtype(param_dtype).itemsize)

    # TODO(synk): for very large H (resident (H,H) weight >~ 24 MiB, esp. v7x's
    # 64 MiB VMEM), add a K/N tiling grid axis with a VMEM f32 accumulator and
    # pl.when init/finalize, and single-buffer the grid-invariant weight blocks
    # (pipeline_mode=pl.Buffered(1)).
    out1_2d, out2_p = pl.pallas_call(
        _woperator_kernel,
        out_shape=out_shape,
        grid=(grid_b,),
        in_specs=[
            pl.BlockSpec((TB, 3 * H), lambda i: (i, 0)),   # vec tile (lane-dense)
            pl.BlockSpec((3, H), lambda i: (0, 0)),        # cross weight (resident)
            pl.BlockSpec((H, H), lambda i: (0, 0)),        # linear weight (resident)
            pl.BlockSpec((4, H), lambda i: (0, 0)),        # bias slab (resident)
        ],
        out_specs=(
            pl.BlockSpec((TB, 3 * H), lambda i: (i, 0)),
            pl.BlockSpec((TB, H), lambda i: (i, 0)),
        ),
        scratch_shapes=[pltpu.VMEM((4 * TB, H), param_dtype)],
        compiler_params=pltpu.CompilerParams(
            dimension_semantics=("parallel",),             # megacore over batch
            vmem_limit_bytes=vmem_limit,
        ),
    )(vec2d, wc, wt, bias4)

    out1 = out1_2d[:B].reshape(B, 3, H)                    # free when Bp == B
    out2 = out2_p[:B]
    return out1, out2


def _reference(vec, w_cross, lin_weight, lin_bias):
    """Pure-JAX reference matching the PyTorch module."""
    ss = jnp.sum(lin_bias ** 2, axis=1)
    norm = jnp.maximum(jnp.sqrt(ss + 1e-8), 1e-6)
    bias_adj = (lin_bias / norm[:, None]).T[None]          # (1, 3, H)

    def linear(x):
        return jnp.einsum('bth,oh->bto', x, lin_weight) + bias_adj

    cross = jnp.cross(vec, jnp.broadcast_to(w_cross, vec.shape), axis=1)
    return linear(cross), jnp.sum(linear(vec), axis=1)


def _make_inputs(key, B, H):
    k_vec, k_w, k_lw, k_lb = jax.random.split(key, 4)
    vec = jax.random.normal(k_vec, (B, 3, H), dtype=jnp.float32)
    w_cross = jax.random.normal(k_w, (1, 3, H), dtype=jnp.float32)
    bound = (6.0 / (H + H)) ** 0.5
    lin_weight = jax.random.uniform(k_lw, (H, H), dtype=jnp.float32,
                                    minval=-bound, maxval=bound)
    lin_bias = 0.1 * jax.random.normal(k_lb, (H, 3), dtype=jnp.float32)
    return vec, w_cross, lin_weight, lin_bias


def _check(out1, out2, ref1, ref2, B, H):
    assert out1.shape == (B, 3, H) and out2.shape == (B, H)
    assert jnp.allclose(out1, ref1, atol=1e-4, rtol=1e-4)
    assert jnp.allclose(out2, ref2, atol=1e-4, rtol=1e-4)


if __name__ == "__main__":
    key = jax.random.PRNGKey(0)
    k1, k2, k3 = jax.random.split(key, 3)

    # Small case matching the module's natural shapes (B padded up to 8, H=32
    # stays unpadded on the lane axis).
    vec, w_cross, lin_weight, lin_bias = _make_inputs(k1, B=2, H=32)
    out1, out2 = woperator_forward(vec, w_cross, lin_weight, lin_bias)
    jax.block_until_ready((out1, out2))
    ref1, ref2 = _reference(vec, w_cross, lin_weight, lin_bias)
    _check(out1, out2, ref1, ref2, 2, 32)

    # Ragged batch + non-128-multiple H + explicit small tile (grid=3, pad path).
    vec, w_cross, lin_weight, lin_bias = _make_inputs(k2, B=20, H=160)
    out1, out2 = woperator_forward(vec, w_cross, lin_weight, lin_bias, block_b=8)
    jax.block_until_ready((out1, out2))
    ref1, ref2 = _reference(vec, w_cross, lin_weight, lin_bias)
    _check(out1, out2, ref1, ref2, 20, 160)

    # Aligned case: auto TB splits the batch in two grid steps (megacore path),
    # no batch padding, lane-aligned H.
    vec, w_cross, lin_weight, lin_bias = _make_inputs(k3, B=48, H=128)
    out1, out2 = woperator_forward(vec, w_cross, lin_weight, lin_bias)
    jax.block_until_ready((out1, out2))
    ref1, ref2 = _reference(vec, w_cross, lin_weight, lin_bias)
    _check(out1, out2, ref1, ref2, 48, 128)

    print("KERNEL_OK")
</pallas_src>

<mosaic_0001>
module attributes {stable_mosaic.version = 11 : i64} {
  func.func @_woperator_kernel(%arg0: i32, %arg1: memref<8x96xf32, #tpu.memory_space<vmem>>, %arg2: memref<3x32xf32, #tpu.memory_space<vmem>>, %arg3: memref<32x32xf32, #tpu.memory_space<vmem>>, %arg4: memref<4x32xf32, #tpu.memory_space<vmem>>, %arg5: memref<8x96xf32, #tpu.memory_space<vmem>>, %arg6: memref<8x32xf32, #tpu.memory_space<vmem>>, %arg7: memref<32x32xf32, #tpu.memory_space<vmem>>) attributes {dimension_semantics = [#tpu.dimension_semantics<parallel>], iteration_bounds = array<i64: 1>, scalar_prefetch = 0 : i64, scratch_operands = 1 : i64, tpu.core_type = #tpu.core_type<tc>, window_params = [{transform_indices = @transform_0, window_bounds = array<i64: 8, 96>}, {pipeline_mode = #tpu.pipeline_mode<synchronous>, transform_indices = @transform_1, window_bounds = array<i64: 3, 32>}, {pipeline_mode = #tpu.pipeline_mode<synchronous>, transform_indices = @transform_2, window_bounds = array<i64: 32, 32>}, {pipeline_mode = #tpu.pipeline_mode<synchronous>, transform_indices = @transform_3, window_bounds = array<i64: 4, 32>}, {transform_indices = @transform_4, window_bounds = array<i64: 8, 96>}, {transform_indices = @transform_5, window_bounds = array<i64: 8, 32>}]} {
    %c0 = arith.constant 0 : index
    %c0_0 = arith.constant 0 : index
    %0 = vector.load %arg1[%c0, %c0_0] : memref<8x96xf32, #tpu.memory_space<vmem>>, vector<8x32xf32>
    %c0_1 = arith.constant 0 : index
    %c32 = arith.constant 32 : index
    %1 = vector.load %arg1[%c0_1, %c32] : memref<8x96xf32, #tpu.memory_space<vmem>>, vector<8x32xf32>
    %c0_2 = arith.constant 0 : index
    %c64 = arith.constant 64 : index
    %2 = vector.load %arg1[%c0_2, %c64] : memref<8x96xf32, #tpu.memory_space<vmem>>, vector<8x32xf32>
    %c0_3 = arith.constant 0 : index
    %c0_4 = arith.constant 0 : index
    %3 = vector.load %arg2[%c0_3, %c0_4] : memref<3x32xf32, #tpu.memory_space<vmem>>, vector<3x32xf32>
    %4 = vector.extract_strided_slice %3 {offsets = [0, 0], sizes = [1, 32], strides = [1, 1]} : vector<3x32xf32> to vector<1x32xf32>
    %5 = vector.extract_strided_slice %3 {offsets = [1, 0], sizes = [1, 32], strides = [1, 1]} : vector<3x32xf32> to vector<1x32xf32>
    %6 = vector.extract_strided_slice %3 {offsets = [2, 0], sizes = [1, 32], strides = [1, 1]} : vector<3x32xf32> to vector<1x32xf32>
    %7 = vector.broadcast %6 : vector<1x32xf32> to vector<8x32xf32>
    %8 = arith.mulf %1, %7 : vector<8x32xf32>
    %9 = vector.broadcast %5 : vector<1x32xf32> to vector<8x32xf32>
    %10 = arith.mulf %2, %9 : vector<8x32xf32>
    %11 = arith.subf %8, %10 : vector<8x32xf32>
    %c0_5 = arith.constant 0 : index
    %c0_6 = arith.constant 0 : index
    %12 = vector.load %arg7[%c0_5, %c0_6] : memref<32x32xf32, #tpu.memory_space<vmem>>, vector<8x32xf32>
    tpu.vector_store %arg7[%c0_5, %c0_6], %11 {strides = array<i32>} : memref<32x32xf32, #tpu.memory_space<vmem>>, vector<8x32xf32>,
    %13 = vector.broadcast %4 : vector<1x32xf32> to vector<8x32xf32>
    %14 = arith.mulf %2, %13 : vector<8x32xf32>
    %15 = vector.broadcast %6 : vector<1x32xf32> to vector<8x32xf32>
    %16 = arith.mulf %0, %15 : vector<8x32xf32>
    %17 = arith.subf %14, %16 : vector<8x32xf32>
    %c8 = arith.constant 8 : index
    %c0_7 = arith.constant 0 : index
    %18 = vector.load %arg7[%c8, %c0_7] : memref<32x32xf32, #tpu.memory_space<vmem>>, vector<8x32xf32>
    tpu.vector_store %arg7[%c8, %c0_7], %17 {strides = array<i32>} : memref<32x32xf32, #tpu.memory_space<vmem>>, vector<8x32xf32>,
    %19 = vector.broadcast %5 : vector<1x32xf32> to vector<8x32xf32>
    %20 = arith.mulf %0, %19 : vector<8x32xf32>
    %21 = vector.broadcast %4 : vector<1x32xf32> to vector<8x32xf32>
    %22 = arith.mulf %1, %21 : vector<8x32xf32>
    %23 = arith.subf %20, %22 : vector<8x32xf32>
    %c16 = arith.constant 16 : index
    %c0_8 = arith.constant 0 : index
    %24 = vector.load %arg7[%c16, %c0_8] : memref<32x32xf32, #tpu.memory_space<vmem>>, vector<8x32xf32>
    tpu.vector_store %arg7[%c16, %c0_8], %23 {strides = array<i32>} : memref<32x32xf32, #tpu.memory_space<vmem>>, vector<8x32xf32>,
    %25 = arith.addf %0, %1 : vector<8x32xf32>
    %26 = arith.addf %25, %2 : vector<8x32xf32>
    %c24 = arith.constant 24 : index
    %c0_9 = arith.constant 0 : index
    %27 = vector.load %arg7[%c24, %c0_9] : memref<32x32xf32, #tpu.memory_space<vmem>>, vector<8x32xf32>
    tpu.vector_store %arg7[%c24, %c0_9], %26 {strides = array<i32>} : memref<32x32xf32, #tpu.memory_space<vmem>>, vector<8x32xf32>,
    %c0_10 = arith.constant 0 : index
    %c0_11 = arith.constant 0 : index
    %28 = vector.load %arg7[%c0_10, %c0_11] : memref<32x32xf32, #tpu.memory_space<vmem>>, vector<32x32xf32>
    %c0_12 = arith.constant 0 : index
    %c0_13 = arith.constant 0 : index
    %29 = vector.load %arg3[%c0_12, %c0_13] : memref<32x32xf32, #tpu.memory_space<vmem>>, vector<32x32xf32>
    %cst = arith.constant dense<0.000000e+00> : vector<32x32xf32>
    %30 = tpu.matmul %28, %29, %cst {dimension_numbers = #tpu.dot_dimension_numbers<[1], [0], [0], [1], [0, 0, 1, 1], [], []>} : vector<32x32xf32>, vector<32x32xf32>, vector<32x32xf32> -> vector<32x32xf32>
    %c0_14 = arith.constant 0 : index
    %c0_15 = arith.constant 0 : index
    %31 = vector.load %arg4[%c0_14, %c0_15] : memref<4x32xf32, #tpu.memory_space<vmem>>, vector<4x32xf32>
    %32 = vector.extract_strided_slice %30 {offsets = [0, 0], sizes = [8, 32], strides = [1, 1]} : vector<32x32xf32> to vector<8x32xf32>
    %33 = vector.extract_strided_slice %31 {offsets = [0, 0], sizes = [1, 32], strides = [1, 1]} : vector<4x32xf32> to vector<1x32xf32>
    %34 = vector.broadcast %33 : vector<1x32xf32> to vector<8x32xf32>
    %35 = arith.addf %32, %34 : vector<8x32xf32>
    %c0_16 = arith.constant 0 : index
    %c0_17 = arith.constant 0 : index
    %36 = vector.load %arg5[%c0_16, %c0_17] : memref<8x96xf32, #tpu.memory_space<vmem>>, vector<8x32xf32>
    tpu.vector_store %arg5[%c0_16, %c0_17], %35 {strides = array<i32>} : memref<8x96xf32, #tpu.memory_space<vmem>>, vector<8x32xf32>,
    %37 = vector.extract_strided_slice %30 {offsets = [8, 0], sizes = [8, 32], strides = [1, 1]} : vector<32x32xf32> to vector<8x32xf32>
    %38 = vector.extract_strided_slice %31 {offsets = [1, 0], sizes = [1, 32], strides = [1, 1]} : vector<4x32xf32> to vector<1x32xf32>
    %39 = vector.broadcast %38 : vector<1x32xf32> to vector<8x32xf32>
    %40 = arith.addf %37, %39 : vector<8x32xf32>
    %c0_18 = arith.constant 0 : index
    %c32_19 = arith.constant 32 : index
    %41 = vector.load %arg5[%c0_18, %c32_19] : memref<8x96xf32, #tpu.memory_space<vmem>>, vector<8x32xf32>
    tpu.vector_store %arg5[%c0_18, %c32_19], %40 {strides = array<i32>} : memref<8x96xf32, #tpu.memory_space<vmem>>, vector<8x32xf32>,
    %42 = vector.extract_strided_slice %30 {offsets = [16, 0], sizes = [8, 32], strides = [1, 1]} : vector<32x32xf32> to vector<8x32xf32>
    %43 = vector.extract_strided_slice %31 {offsets = [2, 0], sizes = [1, 32], strides = [1, 1]} : vector<4x32xf32> to vector<1x32xf32>
    %44 = vector.broadcast %43 : vector<1x32xf32> to vector<8x32xf32>
    %45 = arith.addf %42, %44 : vector<8x32xf32>
    %c0_20 = arith.constant 0 : index
    %c64_21 = arith.constant 64 : index
    %46 = vector.load %arg5[%c0_20, %c64_21] : memref<8x96xf32, #tpu.memory_space<vmem>>, vector<8x32xf32>
    tpu.vector_store %arg5[%c0_20, %c64_21], %45 {strides = array<i32>} : memref<8x96xf32, #tpu.memory_space<vmem>>, vector<8x32xf32>,
    %47 = vector.extract_strided_slice %30 {offsets = [24, 0], sizes = [8, 32], strides = [1, 1]} : vector<32x32xf32> to vector<8x32xf32>
    %48 = vector.extract_strided_slice %31 {offsets = [3, 0], sizes = [1, 32], strides = [1, 1]} : vector<4x32xf32> to vector<1x32xf32>
    %49 = vector.broadcast %48 : vector<1x32xf32> to vector<8x32xf32>
    %50 = arith.addf %47, %49 : vector<8x32xf32>
    %c0_22 = arith.constant 0 : index
    %c0_23 = arith.constant 0 : index
    %51 = vector.load %arg6[%c0_22, %c0_23] : memref<8x32xf32, #tpu.memory_space<vmem>>, vector<8x32xf32>
    tpu.vector_store %arg6[%c0_22, %c0_23], %50 {strides = array<i32>} : memref<8x32xf32, #tpu.memory_space<vmem>>, vector<8x32xf32>,
    return
  }
  func.func @transform_0(%arg0: i32) -> (i32, i32) {
    %c0_i32 = arith.constant 0 : i32
    %c0_i32_0 = arith.constant 0 : i32
    return %arg0, %c0_i32 : i32, i32
  }
  func.func @transform_1(%arg0: i32) -> (i32, i32) {
    %c0_i32 = arith.constant 0 : i32
    %c0_i32_0 = arith.constant 0 : i32
    %c0_i32_1 = arith.constant 0 : i32
    return %c0_i32, %c0_i32_0 : i32, i32
  }
  func.func @transform_2(%arg0: i32) -> (i32, i32) {
    %c0_i32 = arith.constant 0 : i32
    %c0_i32_0 = arith.constant 0 : i32
    %c0_i32_1 = arith.constant 0 : i32
    return %c0_i32, %c0_i32_0 : i32, i32
  }
  func.func @transform_3(%arg0: i32) -> (i32, i32) {
    %c0_i32 = arith.constant 0 : i32
    %c0_i32_0 = arith.constant 0 : i32
    %c0_i32_1 = arith.constant 0 : i32
    return %c0_i32, %c0_i32_0 : i32, i32
  }
  func.func @transform_4(%arg0: i32) -> (i32, i32) {
    %c0_i32 = arith.constant 0 : i32
    %c0_i32_0 = arith.constant 0 : i32
    return %arg0, %c0_i32 : i32, i32
  }
  func.func @transform_5(%arg0: i32) -> (i32, i32) {
    %c0_i32 = arith.constant 0 : i32
    %c0_i32_0 = arith.constant 0 : i32
    return %arg0, %c0_i32 : i32, i32
  }
}

</mosaic_0001>

<bundles_post_ra>
// kernel: tpu_custom_call.1
= control target key start
LH: loop header
LB: loop body
LE: loop exit
PB: predicated region body
PF: predicated region fallthrough
CT: control target
= control target key end

     0   :  { %11 = vsyncpa [#allocation4], 0  ;;  %s606_s0 = inlined_call_operand.hbm [shape: f32[8,96], index: 0, kind: input, shape index: {}]   ;;  %s607_s1 = inlined_call_operand.hbm [shape: f32[3,32], index: 1, kind: input, shape index: {}]   ;;  %s608_s2 = inlined_call_operand.hbm [shape: f32[32,32], index: 2, kind: input, shape index: {}]   ;;  %s609_s3 = inlined_call_operand.vmem [shape: f32[4,32], index: 3, kind: input, shape index: {}]   ;;  %s610_s4 = inlined_call_operand.hbm [shape: f32[8,96], index: 4, kind: output, shape index: {0}]   ;;  %s611_s5 = inlined_call_operand.hbm [shape: f32[8,32], index: 5, kind: output, shape index: {1}]  }
   0x1   :  { %12 = vsyncpa [#allocation7], 0 }
   0x2   :  { %13 = vsyncpa [#allocation5], 0 }
   0x3   :  { %14 = vsyncpa [#allocation11], 0  ;;  %s466_s18 = smov [#allocation6]   ;;  %s467_s20 = smov [#allocation3]  }
   0x4   :  { %s31_s19 = sshll.u32 %s466_s18, 4  ;;  %s21_s21 = sshll.u32 %s467_s20, 4  ;;  %s32_s19 = int_to_ptr.vmem [resolvable:$true] %s31_s19  ;;  %s22_s21 = int_to_ptr.vmem [resolvable:$true] %s21_s21 }
   0x5   :  { %s348_s24 = scalar_lea.hbm %s607_s1, 64 }
   0x6   :  { %p349_p0 = scmp.ne.s32.totalorder %s607_s1, %s348_s24  ;;  %p352_p1 = scmp.lt.u32.totalorder %s348_s24, %s607_s1 }
   0x8   :  { %p354_p2 = pnand %p352_p1, %p349_p0 }
   0xa   :  { %357 = shalt.err (!%p354_p2)
}
   0xb   :  { %s358_s29 = scalar_lea.vmem %s32_s19, 64  ;;  %p363_p4 = scmp.lt.s32.totalorder %s32_s19, %s32_s19 }
   0xc   :  { %p359_p3 = scmp.ne.s32.totalorder %s32_s19, %s358_s29  ;;  %p364_p5 = scmp.lt.s32.totalorder %s358_s29, %s358_s29 }
   0xe   :  { %p365_p6 = por %p364_p5, %p363_p4 }
  0x10   :  { %p366_p7 = pnand %p365_p6, %p359_p3 }
  0x12   :  { %369 = shalt.err (!%p366_p7)
}
  0x13   :  { %34 = dma.hbm_to_vmem [thread:$0]  %s607_s1, 64, %s32_s19, [#allocation7]  }
  0x14   :  { %s370_s9 = scalar_lea.hbm %s606_s0, 128 }
  0x15   :  { %p371_p8 = scmp.ne.s32.totalorder %s606_s0, %s370_s9  ;;  %p374_p9 = scmp.lt.u32.totalorder %s370_s9, %s606_s0 }
  0x17   :  { %p376_p10 = pnand %p374_p9, %p371_p8 }
  0x19   :  { %379 = shalt.err (!%p376_p10)
}
  0x1a   :  { %s380_s14 = scalar_lea.vmem %s22_s21, 128  ;;  %p385_p12 = scmp.lt.s32.totalorder %s22_s21, %s22_s21 }
  0x1b   :  { %p381_p11 = scmp.ne.s32.totalorder %s22_s21, %s380_s14  ;;  %p386_p13 = scmp.lt.s32.totalorder %s380_s14, %s380_s14 }
  0x1d   :  { %p387_p0 = por %p386_p13, %p385_p12 }
  0x1f   :  { %p388_p1 = pnand %p387_p0, %p381_p11 }
  0x21   :  { %391 = shalt.err (!%p388_p1)
}
  0x22   :  { %24 = dma.hbm_to_vmem [thread:$0]  %s606_s0, 128, %s22_s21, [#allocation4]  }
  0x23   :  { %s468_s16 = smov [#allocation8]   ;;  %s392_s20 = scalar_lea.hbm %s608_s2, 512 }
  0x24   :  { %s40_s17 = sshll.u32 %s468_s16, 4  ;;  %p393_p2 = scmp.ne.s32.totalorder %s608_s2, %s392_s20  ;;  %s41_s17 = int_to_ptr.vmem [resolvable:$true] %s40_s17 }
  0x25   :  { %p396_p3 = scmp.lt.u32.totalorder %s392_s20, %s608_s2 }
  0x27   :  { %p398_p4 = pnand %p396_p3, %p393_p2 }
  0x29   :  { %401 = shalt.err (!%p398_p4)
}
  0x2a   :  { %s402_s26 = scalar_lea.vmem %s41_s17, 512  ;;  %p407_p6 = scmp.lt.s32.totalorder %s41_s17, %s41_s17 }
  0x2b   :  { %p403_p5 = scmp.ne.s32.totalorder %s41_s17, %s402_s26  ;;  %p408_p7 = scmp.lt.s32.totalorder %s402_s26, %s402_s26 }
  0x2d   :  { %p409_p8 = por %p408_p7, %p407_p6 }
  0x2f   :  { %p410_p9 = pnand %p409_p8, %p403_p5 }
  0x31   :  { %413 = shalt.err (!%p410_p9)
}
  0x32   :  { %s469_s0 = smov 128   ;;  %s470_s21 = smov 8  }
  0x33   :  { %46 = dma.hbm_to_vmem [thread:$0]  %s608_s2, 512, %s41_s17, [#allocation7], %s469_s0, %s469_s0, %s470_s21  }
  0x34   :  { %458 = dma.done.wait [#allocation4], 128  }
  0x35   :  { %459 = vsyncadd [#allocation4], 4294967168 }
  0x36   :  { %460 = dma.done.wait [#allocation7], 576  }
  0x37   :  { %461 = vsyncadd [#allocation7], 4294966720  ;;  %v60_v0 = vlaneseq  ;;  %v59_v5 = vld [vmem:[#allocation6] sm:$0x7]  ;;  %s471_s2 = smov 64   ;;  %s472_s29 = smov 32  }
  0x38   :  { %v58_v9 = vld [vmem:[#allocation3] sm:$0xff]  ;;  %v134_v13 = vld [vmem:[#allocation8] sm:$0xff]  ;;  %v135_v14 = vld [vmem:[#allocation8 + $0x8] sm:$0xff]  ;;  %s473_s30 = smov 96   ;;  %vm87_vm0 = vcmask 261120   ;;  %s474_s8 = smov [#allocation10]  }
  0x39   :  { %v542_v1 = vshrl.u32 %v60_v0, 7  ;;  %v326_v17 = vpack.c.bf16 %v135_v14, %v134_v13  ;;  %v136_v22 = vld [vmem:[#allocation8 + $0x10] sm:$0xff]  ;;  %v137_v23 = vld [vmem:[#allocation8 + $0x18] sm:$0xff]  ;;  %s286_s9 = sshll.u32 %s474_s8, 4  ;;  %s287_s9 = int_to_ptr.vmem [resolvable:$true] %s286_s9 }
  0x3a   :  { %v330_v24 = vpack.c.bf16 %v137_v23, %v136_v22  ;;  %v235_v43 = vld [vmem:[%s609_s3] sm:$0xf]  ;;  %s414_s10 = scalar_lea.vmem %s287_s9, 128  ;;  %p419_p11 = scmp.lt.s32.totalorder %s287_s9, %s287_s9 }
  0x3b   :  { %v71_v2 = vsub.s32 1, %v542_v1  ;;  %v91_v3 = vsub.s32 0, %v542_v1  ;;  %v62_v4 = vsub.s32 2, %v542_v1  ;;  %334 = vmatprep.subr.bf16.mxu1 %v326_v17  ;;  %327 = vmatprep.subr.bf16.mxu0 %v326_v17  ;;  %v266_v42 = vsub.s32 3, %v542_v1  ;;  %p415_p10 = scmp.ne.s32.totalorder %s287_s9, %s414_s10  ;;  %p420_p12 = scmp.lt.s32.totalorder %s414_s10, %s414_s10 }
  0x3c   :  { %336 = vmatpush3.bf16.msra.mxu1 %v326_v17  ;;  %329 = vmatpush3.bf16.msra.mxu0 %v326_v17 }
  0x3d   :  { %v72_v6 = vrot.slane %v59_v5, %v71_v2  ;;  %v92_v7 = vrot.slane %v59_v5, %v91_v3  ;;  %v63_v8 = vrot.slane %v59_v5, %v62_v4  ;;  %335 = vmatprep.subr.bf16.mxu1 %v330_v24  ;;  %331 = vmatprep.subr.bf16.mxu0 %v330_v24  ;;  %p421_p13 = por %p420_p12, %p419_p11 }
  0x3e   :  { %v267_v44 = vrot.slane %v235_v43, %v266_v42  ;;  %v256_v45 = vrot.slane %v235_v43, %v62_v4 }
  0x3f   :  { %74 = vrot.lane.b32.xlu0 %v72_v6, %s471_s2  ;;  %110 = vrot.lane.b32.xlu1 %v92_v7, %s472_s29  ;;  %v98_v10 = vmul.f32 %v63_v8, %v58_v9  ;;  %v109_v26 = vmul.f32 %v72_v6, %v58_v9  ;;  %p422_p0 = pnand %p421_p13, %p415_p10 }
  0x40   :  { %337 = vmatpush3.bf16.msra.mxu1 %v330_v24  ;;  %333 = vmatpush3.bf16.msra.mxu0 %v330_v24 }
  0x43   :  { %94 = vrot.lane.b32.xlu1 %v92_v7, %s471_s2  ;;  %65 = vrot.lane.b32.xlu0 %v63_v8, %s472_s29 }
  0x47   :  { %100 = vrot.lane.b32.xlu1 %v98_v10, %s471_s2 }
  0xb1   :  { %v75_v11 = vpop.permute.xlu0 %74  ;;  %v111_v12 = vpop.permute.xlu1 %110 }
  0xb2   :  { %v77_v15 = vmul.f32 %v75_v11, %v58_v9  ;;  %v113_v16 = vmul.f32 %v111_v12, %v58_v9 }
  0xb4   :  { %79 = vrot.lane.b32.xlu0 %v77_v15, %s473_s30  ;;  %115 = vrot.lane.b32.xlu1 %v113_v16, %s473_s30 }
  0xb5   :  { %v95_v18 = vpop.permute.xlu1 %94  ;;  %v66_v25 = vpop.permute.xlu0 %65 }
  0xb6   :  { %v97_v19 = vmul.f32 %v95_v18, %v58_v9  ;;  %v68_v27 = vmul.f32 %v66_v25, %v58_v9 }
  0xb8   :  { %121 = vrot.lane.b32.xlu0 %v58_v9, %s473_s30 }
  0xb9   :  { %v101_v20 = vpop.permute.xlu1 %100 }
  0xba   :  { %v103_v21 = vsub.f32 %v97_v19, %v101_v20 }
  0xbc   :  { %125 = vrot.lane.b32.xlu0 %v58_v9, %s471_s2 }
  0xc0   :  { %105 = vrot.lane.b32.xlu0 %v103_v21, %s471_s2 }
 0x126   :  { %v80_v28 = vpop.permute.xlu0 %79  ;;  %v116_v29 = vpop.permute.xlu1 %115 }
 0x127   :  { %v82_v30 = vsub.f32 %v68_v27, %v80_v28  ;;  %v118_v31 = vsub.f32 %v109_v26, %v116_v29 }
 0x129   :  { %84 = vrot.lane.b32.xlu1 %v82_v30, %s473_s30  ;;  %119 = vst.msk [vmem:[#allocation2 + $0x10] sm:$0xff] %vm87_vm0, %v118_v31 }
 0x12a   :  { %v122_v32 = vpop.permute.xlu0 %121 }
 0x12b   :  { %v124_v33 = vadd.f32 %v122_v32, %v58_v9 }
 0x12e   :  { %v126_v34 = vpop.permute.xlu0 %125 }
 0x12f   :  { %v128_v35 = vadd.f32 %v126_v34, %v124_v33 }
 0x130   :  { %v132_v36 = vld [vmem:[#allocation2 + $0x10] sm:$0xff] }
 0x131   :  { %129 = vst.msk [vmem:[#allocation2 + $0x18] sm:$0xff] %vm87_vm0, %v128_v35  ;;  %323 = vmatprep.mubr.msk.f32.mxu1 %vm87_vm0, %v132_v36 }
 0x132   :  { %v106_v37 = vpop.permute.xlu0 %105 }
 0x133   :  { %108 = vst.msk [vmem:[#allocation2 + $0x8] sm:$0xff] %vm87_vm0, %v106_v37 }
 0x138   :  { %v133_v38 = vld [vmem:[#allocation2 + $0x18] sm:$0xff] }
 0x139   :  { %324 = vmatmul.mubr.msk.f32.vlgmr.msra.gmra.mrb[0].mxu1 %vm87_vm0, %v133_v38 }
 0x13a   :  { %v131_v41 = vld [vmem:[#allocation2 + $0x8] sm:$0xff] }
 0x19b   :  { %v85_v39 = vpop.permute.xlu1 %84 }
 0x19c   :  { %88 = vst.msk [vmem:[#allocation2] sm:$0xff] %vm87_vm0, %v85_v39 }
 0x1a3   :  { %v130_v40 = vld [vmem:[#allocation2] sm:$0xff] }
 0x1a4   :  { %320 = vmatprep.mubr.msk.f32.mxu0 %vm87_vm0, %v130_v40 }
 0x1a5   :  { %321 = vmatmul.mubr.msk.f32.vlgmr.msra.gmra.mrb[0].mxu0 %vm87_vm0, %v131_v41 }
 0x20c   :  { %v325_v46 = vpop.f32.mrb[0].mxu1 }
 0x20d   :  { %v268_v47 = vadd.f32 %v325_v46, %v267_v44  ;;  %v226_v48 = vpop.f32.mrb[1].mxu1 }
 0x20e   :  { %v257_v49 = vadd.f32 %v256_v45, %v226_v48 }
 0x20f   :  { %269 = vst.msk [vmem:[#allocation10] sm:$0xff] %vm87_vm0, %v268_v47 }
 0x210   :  { %259 = vrot.lane.b32.xlu0 %v257_v49, %s471_s2 }
 0x211   :  { %425 = shalt.err (!%p422_p0)
}
 0x212   :  { %s426_s12 = scalar_lea.hbm %s611_s5, 128 }
 0x213   :  { %p427_p1 = scmp.ne.s32.totalorder %s611_s5, %s426_s12  ;;  %p430_p2 = scmp.lt.u32.totalorder %s426_s12, %s611_s5 }
 0x215   :  { %p432_p3 = pnand %p430_p2, %p427_p1 }
 0x217   :  { %435 = shalt.err (!%p432_p3)
}
 0x218   :  { %289 = dma.vmem_to_hbm [thread:$0]  %s287_s9, 128, %s611_s5, [#allocation11]   ;;  %v245_v50 = vrot.slane %v235_v43, %v71_v2  ;;  %v239_v51 = vrot.slane %v235_v43, %v91_v3  ;;  %vm251_vm1 = vcmask 523520   ;;  %vm262_vm2 = vcmask 785920  }
 0x219   :  { %s475_s18 = smov [#allocation9]  }
 0x21a   :  { %s276_s19 = sshll.u32 %s475_s18, 4  ;;  %s277_s19 = int_to_ptr.vmem [resolvable:$true] %s276_s19 }
 0x21b   :  { %s436_s5 = scalar_lea.vmem %s277_s19, 128  ;;  %p441_p5 = scmp.lt.s32.totalorder %s277_s19, %s277_s19 }
 0x21c   :  { %p437_p4 = scmp.ne.s32.totalorder %s277_s19, %s436_s5  ;;  %p442_p6 = scmp.lt.s32.totalorder %s436_s5, %s436_s5 }
 0x21e   :  { %p443_p7 = por %p442_p6, %p441_p5 }
 0x220   :  { %p444_p8 = pnand %p443_p7, %p437_p4 }
 0x278   :  { %v322_v52 = vpop.f32.mrb[0].mxu0 }
 0x279   :  { %v246_v53 = vadd.f32 %v322_v52, %v245_v50  ;;  %v216_v54 = vpop.f32.mrb[1].mxu0 }
 0x27a   :  { %v240_v55 = vadd.f32 %v239_v51, %v216_v54 }
 0x27b   :  { %248 = vrot.lane.b32.xlu1 %v246_v53, %s472_s29 }
 0x27c   :  { %241 = vst.msk [vmem:[#allocation9] sm:$0xff] %vm87_vm0, %v240_v55 }
 0x282   :  { %v260_v57 = vpop.permute.xlu0 %259 }
 0x2ed   :  { %v249_v56 = vpop.permute.xlu1 %248 }
 0x2ee   :  { %252 = vst.msk [vmem:[#allocation9] sm:$0xff] %vm251_vm1, %v249_v56 }
 0x2ef   :  { %263 = vst.msk [vmem:[#allocation9] sm:$0xff] %vm262_vm2, %v260_v57 }
 0x2f0   :  { %447 = shalt.err (!%p444_p8)
}
 0x2f1   :  { %s448_s23 = scalar_lea.hbm %s610_s4, 128 }
 0x2f2   :  { %p449_p9 = scmp.ne.s32.totalorder %s610_s4, %s448_s23  ;;  %p452_p10 = scmp.lt.u32.totalorder %s448_s23, %s610_s4 }
 0x2f4   :  { %p454_p11 = pnand %p452_p10, %p449_p9 }
 0x2f6   :  { %457 = shalt.err (!%p454_p11)
}
 0x2f7   :  { %279 = dma.vmem_to_hbm [thread:$0]  %s277_s19, 128, %s610_s4, [#allocation5]  }
 0x2f8   :  { %462 = dma.done.wait [#allocation5], 128  }
 0x2f9   :  { %463 = vsyncadd [#allocation5], 4294967168 }
 0x2fa   :  { %464 = dma.done.wait [#allocation11], 128  }
 0x2fb   :  { %465 = vsyncadd [#allocation11], 4294967168 }
 0x2fc   :  { %296 = vsyncpa [#allocation4], 1 }
 0x2fd   :  { %297 = vsyncpa [#allocation7], 1 }
 0x2fe   :  { %298 = vsyncpa [#allocation5], 1 }
 0x2ff   :  { %299 = vsyncpa [#allocation11], 1 }

</bundles_post_ra>
